<compile_context>
chip_gen: v6e
topology: v6e:2x2x1
jax: 0.10.0
libtpu: 0.0.40
codegen_flags: <defaults>
</compile_context>

<pallas_src>
import jax
import jax.numpy as jnp
from jax.experimental import pallas as pl
from jax.experimental.pallas import tpu as pltpu

# Dropout probabilities (module-level globals in the original d2l script).
DROPOUT1 = 0.2
DROPOUT2 = 0.5


def _round_up(n, m):
    return ((n + m - 1) // m) * m


def _scaled_mask(key, shape, p):
    """Pre-scaled dropout mask matching torch dropout_layer:
    mask = (rand > p).float() / (1 - p).  Values {0, 1/(1-p)} are exact in bf16
    for the probabilities used here."""
    if p <= 0.0:
        return jnp.ones(shape, jnp.bfloat16)
    if p >= 1.0:
        return jnp.zeros(shape, jnp.bfloat16)
    keep = jax.random.uniform(key, shape, jnp.float32) > p
    return keep.astype(jnp.bfloat16) * jnp.bfloat16(1.0 / (1.0 - p))


def _make_kernel(training):
    def kernel(*refs):
        if training:
            (x_ref, w1_ref, b1_ref, w2_ref, b2_ref, w3_ref, b3_ref,
             m1_ref, m2_ref, o_ref) = refs
        else:
            (x_ref, w1_ref, b1_ref, w2_ref, b2_ref, w3_ref, b3_ref,
             o_ref) = refs
            m1_ref = m2_ref = None

        x = x_ref[...]  # (TILE_B, num_inputs) bf16

        # fc1 + ReLU (+ dropout1)
        h1 = jnp.dot(x, w1_ref[...],
                     preferred_element_type=jnp.float32) + b1_ref[...]
        h1 = jnp.maximum(h1, 0.0)
        if m1_ref is not None:
            h1 = h1 * m1_ref[...].astype(jnp.float32)
        h1 = h1.astype(w2_ref.dtype)

        # fc2 + ReLU (+ dropout2)
        h2 = jnp.dot(h1, w2_ref[...],
                     preferred_element_type=jnp.float32) + b2_ref[...]
        h2 = jnp.maximum(h2, 0.0)
        if m2_ref is not None:
            h2 = h2 * m2_ref[...].astype(jnp.float32)
        h2 = h2.astype(w3_ref.dtype)

        # fc3 (no activation); output slab is 128-padded -> lane-dense store.
        out = jnp.dot(h2, w3_ref[...],
                      preferred_element_type=jnp.float32) + b3_ref[...]
        o_ref[...] = out.astype(o_ref.dtype)

    return kernel


def init_net_params(key, num_inputs, num_outputs, num_hiddens1, num_hiddens2):
    """Deterministic init mimicking nn.Linear (uniform +/- 1/sqrt(fan_in)).

    Weights are stored transposed: (in_features, out_features)."""
    ks = jax.random.split(key, 6)

    def linear(kw, kb, fan_in, fan_out):
        bound = 1.0 / jnp.sqrt(fan_in)
        w = jax.random.uniform(kw, (fan_in, fan_out), jnp.float32, -bound, bound)
        b = jax.random.uniform(kb, (1, fan_out), jnp.float32, -bound, bound)
        return w, b

    w1, b1 = linear(ks[0], ks[1], num_inputs, num_hiddens1)
    w2, b2 = linear(ks[2], ks[3], num_hiddens1, num_hiddens2)
    w3, b3 = linear(ks[4], ks[5], num_hiddens2, num_outputs)
    return (w1, b1, w2, b2, w3, b3)


def net_forward(x, params, key, *, num_inputs,
                dropout1=DROPOUT1, dropout2=DROPOUT2, training=True):
    """Forward pass of `Net`. x may be any shape reshapeable to (-1, num_inputs)."""
    w1, b1, w2, b2, w3, b3 = params
    x2d = x.reshape(-1, num_inputs).astype(jnp.float32)
    batch = x2d.shape[0]
    h1_dim = w1.shape[1]
    h2_dim = w2.shape[1]
    num_outputs = w3.shape[1]

    # --- batch tiling (double-buffered pipeline; fits v7x 64 MiB VMEM) ---
    if batch >= 256:
        tile_b = 256
    else:
        tile_b = _round_up(max(batch, 1), 16)
    b_pad = _round_up(batch, tile_b)
    grid = (b_pad // tile_b,)

    # --- lane-dense output: pad final layer width to a multiple of 128 ---
    n_pad = _round_up(num_outputs, 128)

    x_bf = jnp.pad(x2d, ((0, b_pad - batch), (0, 0))).astype(jnp.bfloat16)
    w1b = w1.astype(jnp.bfloat16)
    w2b = w2.astype(jnp.bfloat16)
    w3p = jnp.pad(w3, ((0, 0), (0, n_pad - num_outputs))).astype(jnp.bfloat16)
    b1f = b1.astype(jnp.float32)
    b2f = b2.astype(jnp.float32)
    b3p = jnp.pad(b3, ((0, 0), (0, n_pad - num_outputs))).astype(jnp.float32)

    inputs = [x_bf, w1b, b1f, w2b, b2f, w3p, b3p]
    in_specs = [
        pl.BlockSpec((tile_b, num_inputs), lambda i: (i, 0)),   # x tile
        pl.BlockSpec((num_inputs, h1_dim), lambda i: (0, 0)),   # W1 resident
        pl.BlockSpec((1, h1_dim), lambda i: (0, 0)),            # b1 resident
        pl.BlockSpec((h1_dim, h2_dim), lambda i: (0, 0)),       # W2 resident
        pl.BlockSpec((1, h2_dim), lambda i: (0, 0)),            # b2 resident
        pl.BlockSpec((h2_dim, n_pad), lambda i: (0, 0)),        # W3 resident
        pl.BlockSpec((1, n_pad), lambda i: (0, 0)),             # b3 resident
    ]

    bytes_accessed = (x_bf.size * 2 + w1b.size * 2 + w2b.size * 2 + w3p.size * 2
                      + (b1f.size + b2f.size + b3p.size) * 4
                      + b_pad * n_pad * 4)

    if training:
        k1, k2 = jax.random.split(key)
        m1 = _scaled_mask(k1, (b_pad, h1_dim), float(dropout1))
        m2 = _scaled_mask(k2, (b_pad, h2_dim), float(dropout2))
        inputs += [m1, m2]
        in_specs += [
            pl.BlockSpec((tile_b, h1_dim), lambda i: (i, 0)),
            pl.BlockSpec((tile_b, h2_dim), lambda i: (i, 0)),
        ]
        bytes_accessed += (m1.size + m2.size) * 2

    flops = 2 * b_pad * (num_inputs * h1_dim + h1_dim * h2_dim + h2_dim * n_pad)

    out_padded = pl.pallas_call(
        _make_kernel(training),
        out_shape=jax.ShapeDtypeStruct((b_pad, n_pad), jnp.float32),
        grid=grid,
        in_specs=in_specs,
        out_specs=pl.BlockSpec((tile_b, n_pad), lambda i: (i, 0)),
        compiler_params=pltpu.CompilerParams(
            dimension_semantics=("parallel",),
            vmem_limit_bytes=48 * 1024 * 1024,
        ),
        cost_estimate=pl.CostEstimate(
            flops=flops, transcendentals=0, bytes_accessed=bytes_accessed),
    )(*inputs)

    return out_padded[:batch, :num_outputs]


if __name__ == "__main__":
    # Small, module-consistent shapes (mini version of the 784/256/256/10 net).
    num_inputs, num_outputs = 64, 10
    num_hiddens1, num_hiddens2 = 128, 128
    batch = 512  # exercises 2 grid steps with 256-row tiles

    key = jax.random.PRNGKey(0)
    k_x, k_p, k_drop = jax.random.split(key, 3)

    # "Image-like" input that gets flattened to (-1, num_inputs), as in forward().
    x = jax.random.normal(k_x, (batch, 8, 8), dtype=jnp.float32)  # 8*8 == num_inputs
    params = init_net_params(k_p, num_inputs, num_outputs, num_hiddens1, num_hiddens2)

    # Training mode (dropout active).
    out = net_forward(x, params, k_drop, num_inputs=num_inputs,
                      dropout1=DROPOUT1, dropout2=DROPOUT2, training=True)
    out = jax.block_until_ready(out)
    assert out.shape == (batch, num_outputs)
    assert bool(jnp.all(jnp.isfinite(out)))

    # Eval mode (no dropout, pure kernel) — compare against a plain JAX reference.
    out_eval = jax.block_until_ready(
        net_forward(x, params, k_drop, num_inputs=num_inputs, training=False))
    assert out_eval.shape == (batch, num_outputs)

    w1, b1, w2, b2, w3, b3 = params
    x2d = x.reshape(-1, num_inputs)
    h1_ref = jnp.maximum(x2d @ w1 + b1, 0.0)
    h2_ref = jnp.maximum(h1_ref @ w2 + b2, 0.0)
    ref = h2_ref @ w3 + b3
    assert jnp.allclose(out_eval, ref, atol=1e-1, rtol=1e-1)  # bf16 matmul tolerance

    print("KERNEL_OK")
</pallas_src>

<mosaic_0001>
module attributes {stable_mosaic.version = 11 : i64} {
  func.func @kernel(%arg0: i32, %arg1: memref<256x64xbf16, #tpu.memory_space<vmem>>, %arg2: memref<64x128xbf16, #tpu.memory_space<vmem>>, %arg3: memref<1x128xf32, #tpu.memory_space<vmem>>, %arg4: memref<128x128xbf16, #tpu.memory_space<vmem>>, %arg5: memref<1x128xf32, #tpu.memory_space<vmem>>, %arg6: memref<128x128xbf16, #tpu.memory_space<vmem>>, %arg7: memref<1x128xf32, #tpu.memory_space<vmem>>, %arg8: memref<256x128xbf16, #tpu.memory_space<vmem>>, %arg9: memref<256x128xbf16, #tpu.memory_space<vmem>>, %arg10: memref<256x128xf32, #tpu.memory_space<vmem>>) attributes {dimension_semantics = [#tpu.dimension_semantics<parallel>], iteration_bounds = array<i64: 2>, scalar_prefetch = 0 : i64, scratch_operands = 0 : i64, tpu.core_type = #tpu.core_type<tc>, window_params = [{transform_indices = @transform_0, window_bounds = array<i64: 256, 64>}, {pipeline_mode = #tpu.pipeline_mode<synchronous>, transform_indices = @transform_1, window_bounds = array<i64: 64, 128>}, {pipeline_mode = #tpu.pipeline_mode<synchronous>, transform_indices = @transform_2, window_bounds = array<i64: 1, 128>}, {pipeline_mode = #tpu.pipeline_mode<synchronous>, transform_indices = @transform_3, window_bounds = array<i64: 128, 128>}, {pipeline_mode = #tpu.pipeline_mode<synchronous>, transform_indices = @transform_4, window_bounds = array<i64: 1, 128>}, {pipeline_mode = #tpu.pipeline_mode<synchronous>, transform_indices = @transform_5, window_bounds = array<i64: 128, 128>}, {pipeline_mode = #tpu.pipeline_mode<synchronous>, transform_indices = @transform_6, window_bounds = array<i64: 1, 128>}, {transform_indices = @transform_7, window_bounds = array<i64: 256, 128>}, {transform_indices = @transform_8, window_bounds = array<i64: 256, 128>}, {transform_indices = @transform_9, window_bounds = array<i64: 256, 128>}]} {
    %c0 = arith.constant 0 : index
    %c0_0 = arith.constant 0 : index
    %0 = vector.load %arg1[%c0, %c0_0] : memref<256x64xbf16, #tpu.memory_space<vmem>>, vector<256x64xbf16>
    %c0_1 = arith.constant 0 : index
    %c0_2 = arith.constant 0 : index
    %1 = vector.load %arg2[%c0_1, %c0_2] : memref<64x128xbf16, #tpu.memory_space<vmem>>, vector<64x128xbf16>
    %cst = arith.constant dense<0.000000e+00> : vector<256x128xf32>
    %2 = tpu.matmul %0, %1, %cst {dimension_numbers = #tpu.dot_dimension_numbers<[1], [0], [0], [1], [0, 0, 1, 1], [], []>} : vector<256x64xbf16>, vector<64x128xbf16>, vector<256x128xf32> -> vector<256x128xf32>
    %c0_3 = arith.constant 0 : index
    %c0_4 = arith.constant 0 : index
    %3 = vector.load %arg3[%c0_3, %c0_4] : memref<1x128xf32, #tpu.memory_space<vmem>>, vector<1x128xf32>
    %4 = vector.broadcast %3 : vector<1x128xf32> to vector<256x128xf32>
    %5 = arith.addf %2, %4 : vector<256x128xf32>
    %cst_5 = arith.constant 0.000000e+00 : f32
    %6 = vector.broadcast %cst_5 : f32 to vector<256x128xf32>
    %7 = arith.maximumf %5, %6 : vector<256x128xf32>
    %c0_6 = arith.constant 0 : index
    %c0_7 = arith.constant 0 : index
    %8 = vector.load %arg8[%c0_6, %c0_7] : memref<256x128xbf16, #tpu.memory_space<vmem>>, vector<256x128xbf16>
    %9 = arith.extf %8 : vector<256x128xbf16> to vector<256x128xf32>
    %10 = arith.mulf %7, %9 : vector<256x128xf32>
    %11 = arith.truncf %10 : vector<256x128xf32> to vector<256x128xbf16>
    %c0_8 = arith.constant 0 : index
    %c0_9 = arith.constant 0 : index
    %12 = vector.load %arg4[%c0_8, %c0_9] : memref<128x128xbf16, #tpu.memory_space<vmem>>, vector<128x128xbf16>
    %cst_10 = arith.constant dense<0.000000e+00> : vector<256x128xf32>
    %13 = tpu.matmul %11, %12, %cst_10 {dimension_numbers = #tpu.dot_dimension_numbers<[1], [0], [0], [1], [0, 0, 1, 1], [], []>} : vector<256x128xbf16>, vector<128x128xbf16>, vector<256x128xf32> -> vector<256x128xf32>
    %c0_11 = arith.constant 0 : index
    %c0_12 = arith.constant 0 : index
    %14 = vector.load %arg5[%c0_11, %c0_12] : memref<1x128xf32, #tpu.memory_space<vmem>>, vector<1x128xf32>
    %15 = vector.broadcast %14 : vector<1x128xf32> to vector<256x128xf32>
    %16 = arith.addf %13, %15 : vector<256x128xf32>
    %cst_13 = arith.constant 0.000000e+00 : f32
    %17 = vector.broadcast %cst_13 : f32 to vector<256x128xf32>
    %18 = arith.maximumf %16, %17 : vector<256x128xf32>
    %c0_14 = arith.constant 0 : index
    %c0_15 = arith.constant 0 : index
    %19 = vector.load %arg9[%c0_14, %c0_15] : memref<256x128xbf16, #tpu.memory_space<vmem>>, vector<256x128xbf16>
    %20 = arith.extf %19 : vector<256x128xbf16> to vector<256x128xf32>
    %21 = arith.mulf %18, %20 : vector<256x128xf32>
    %22 = arith.truncf %21 : vector<256x128xf32> to vector<256x128xbf16>
    %c0_16 = arith.constant 0 : index
    %c0_17 = arith.constant 0 : index
    %23 = vector.load %arg6[%c0_16, %c0_17] : memref<128x128xbf16, #tpu.memory_space<vmem>>, vector<128x128xbf16>
    %cst_18 = arith.constant dense<0.000000e+00> : vector<256x128xf32>
    %24 = tpu.matmul %22, %23, %cst_18 {dimension_numbers = #tpu.dot_dimension_numbers<[1], [0], [0], [1], [0, 0, 1, 1], [], []>} : vector<256x128xbf16>, vector<128x128xbf16>, vector<256x128xf32> -> vector<256x128xf32>
    %c0_19 = arith.constant 0 : index
    %c0_20 = arith.constant 0 : index
    %25 = vector.load %arg7[%c0_19, %c0_20] : memref<1x128xf32, #tpu.memory_space<vmem>>, vector<1x128xf32>
    %26 = vector.broadcast %25 : vector<1x128xf32> to vector<256x128xf32>
    %27 = arith.addf %24, %26 : vector<256x128xf32>
    %c0_21 = arith.constant 0 : index
    %c0_22 = arith.constant 0 : index
    %28 = vector.load %arg10[%c0_21, %c0_22] : memref<256x128xf32, #tpu.memory_space<vmem>>, vector<256x128xf32>
    tpu.vector_store %arg10[%c0_21, %c0_22], %27 {strides = array<i32>} : memref<256x128xf32, #tpu.memory_space<vmem>>, vector<256x128xf32>,
    return
  }
  func.func @transform_0(%arg0: i32) -> (i32, i32) {
    %c0_i32 = arith.constant 0 : i32
    %c0_i32_0 = arith.constant 0 : i32
    return %arg0, %c0_i32 : i32, i32
  }
  func.func @transform_1(%arg0: i32) -> (i32, i32) {
    %c0_i32 = arith.constant 0 : i32
    %c0_i32_0 = arith.constant 0 : i32
    %c0_i32_1 = arith.constant 0 : i32
    return %c0_i32, %c0_i32_0 : i32, i32
  }
  func.func @transform_2(%arg0: i32) -> (i32, i32) {
    %c0_i32 = arith.constant 0 : i32
    %c0_i32_0 = arith.constant 0 : i32
    %c0_i32_1 = arith.constant 0 : i32
    return %c0_i32, %c0_i32_0 : i32, i32
  }
  func.func @transform_3(%arg0: i32) -> (i32, i32) {
    %c0_i32 = arith.constant 0 : i32
    %c0_i32_0 = arith.constant 0 : i32
    %c0_i32_1 = arith.constant 0 : i32
    return %c0_i32, %c0_i32_0 : i32, i32
  }
  func.func @transform_4(%arg0: i32) -> (i32, i32) {
    %c0_i32 = arith.constant 0 : i32
    %c0_i32_0 = arith.constant 0 : i32
    %c0_i32_1 = arith.constant 0 : i32
    return %c0_i32, %c0_i32_0 : i32, i32
  }
  func.func @transform_5(%arg0: i32) -> (i32, i32) {
    %c0_i32 = arith.constant 0 : i32
    %c0_i32_0 = arith.constant 0 : i32
    %c0_i32_1 = arith.constant 0 : i32
    return %c0_i32, %c0_i32_0 : i32, i32
  }
  func.func @transform_6(%arg0: i32) -> (i32, i32) {
    %c0_i32 = arith.constant 0 : i32
    %c0_i32_0 = arith.constant 0 : i32
    %c0_i32_1 = arith.constant 0 : i32
    return %c0_i32, %c0_i32_0 : i32, i32
  }
  func.func @transform_7(%arg0: i32) -> (i32, i32) {
    %c0_i32 = arith.constant 0 : i32
    %c0_i32_0 = arith.constant 0 : i32
    return %arg0, %c0_i32 : i32, i32
  }
  func.func @transform_8(%arg0: i32) -> (i32, i32) {
    %c0_i32 = arith.constant 0 : i32
    %c0_i32_0 = arith.constant 0 : i32
    return %arg0, %c0_i32 : i32, i32
  }
  func.func @transform_9(%arg0: i32) -> (i32, i32) {
    %c0_i32 = arith.constant 0 : i32
    %c0_i32_0 = arith.constant 0 : i32
    return %arg0, %c0_i32 : i32, i32
  }
}

</mosaic_0001>

<bundles_post_ra>
// kernel: tpu_custom_call.1
= control target key start
LH: loop header
LB: loop body
LE: loop exit
PB: predicated region body
PF: predicated region fallthrough
CT: control target
= control target key end

     0   :  { %s2904_s0 = inlined_call_operand.vmem [shape: bf16[512,64], index: 0, kind: input, shape index: {}]   ;;  %s2905_s1 = inlined_call_operand.hbm [shape: bf16[64,128], index: 1, kind: input, shape index: {}]   ;;  %s2906_s2 = inlined_call_operand.vmem [shape: f32[1,128], index: 2, kind: input, shape index: {}]   ;;  %s2907_s3 = inlined_call_operand.vmem [shape: bf16[128,128], index: 3, kind: input, shape index: {}]   ;;  %s2908_s4 = inlined_call_operand.vmem [shape: f32[1,128], index: 4, kind: input, shape index: {}]   ;;  %s2909_s5 = inlined_call_operand.vmem [shape: bf16[128,128], index: 5, kind: input, shape index: {}]   ;;  %s2910_s6 = inlined_call_operand.vmem [shape: f32[1,128], index: 6, kind: input, shape index: {}]   ;;  %s2911_s7 = inlined_call_operand.vmem [shape: bf16[512,128], index: 7, kind: input, shape index: {}]   ;;  %s2912_s8 = inlined_call_operand.hbm [shape: bf16[512,128], index: 8, kind: input, shape index: {}]   ;;  %s2913_s9 = inlined_call_operand.hbm [shape: f32[512,128], index: 9, kind: output, shape index: {}]  }
   0x1   :  { %2923 = sst [smem:[#allocation13_spill]] %s2905_s1 }
   0x2   :  { %14 = vsyncpa [#allocation3], 0 }
   0x3   :  { %15 = vsyncpa [#allocation6], 0 }
   0x4   :  { %17 = vsyncpa [#allocation6 + $0x1], 0 }
   0x5   :  { %18 = vsyncpa [#allocation4], 0 }
   0x6   :  { %20 = vsyncpa [#allocation4 + $0x1], 0  ;;  %s2406_s30 = smov 0   ;;  %s2408_s10 = smov 0  }
   0x7   :  { %s2410_s11 = smov 0   ;;  %s2412_s12 = smov 0  }
   0x8 LB: > { %s2427_s13 = sadd.s32 4294967295, %s2347_s12   ;;  %s1681_s14 = sadd.s32 4294967294, %s2347_s12   ;;  %s2347_s12 = sphi %s2412_s12, %s2944_s12   ;;  %s2343_s11 = sphi %s2410_s11, %s2947_s11   ;;  %s2339_s10 = sphi %s2408_s10, %s2946_s10   ;;  %s2335_s30 = sphi %s2406_s30, %s2945_s30  }
   0x9   : > { %p224_p0 = scmp.ne.s32.totalorder %s2339_s10, %s2335_s30  ;;  %p2918_p1 = scmp.eq.s32.totalorder %s2427_s13, 0 }
   0xa   : > { %p254_p3 = scmp.eq.s32.totalorder %s1681_s14, 1  ;;  %p1682_p5 = scmp.ge.s32.totalorder %s2347_s12, 1 }
   0xb   : > { %p2436_p4 = por %p2918_p1, %p224_p0  ;;  %p261_p7 = scmp.lt.s32.totalorder %s2347_s12, 3 }
   0xc   : > { %p2441_p6 = por %p254_p3, %p224_p0  ;;  %s2349_s18 = smov [#allocation2]  }
   0xd   : > { %s2924_s15 = scalar_select %p2436_p4, 1, 0 }
   0xe   : > { %s2925_s16 = scalar_select %p2441_p6, 1, 0 }
   0xf   : > { %p2446_p8 = pnand %p1682_p5, %p261_p7  ;;  %s273_s19 = sshll.u32 %s2349_s18, 4  ;;  %s274_s19 = int_to_ptr.vmem [resolvable:$true] %s273_s19 }
  0x10   : > { %2926 = sst [smem:[#allocation11_spill]] %s2925_s16  ;;  %s2460_s21 = sadd.s32 1, %s2347_s12  }
  0x11   : > { %s2927_s17 = scalar_select %p2446_p8, 1, 0 }
  0x12   : > { %p2136_p9 = pneg %p2446_p8  ;;  %2929 = sst [smem:[#allocation12_spill]] %s2460_s21 }
  0x13   : > { %s211_s22 = sadd.s32 1, %s2343_s11  ;;  %s208_s23 = ssub.s32 %s2347_s12, %s2460_s21 }
  0x14   : > { %p2455_p11 = pnand %p2136_p9, %p2918_p1  ;;  %s2236_s24 = scalar_lea.vmem %s274_s19, 512 }
  0x15   : > { %p2237_p13 = scmp.ne.s32.totalorder %s274_s19, %s2236_s24  ;;  %p2244_p5 = scmp.lt.s32.totalorder %s274_s19, %s274_s19 }
  0x16   : > { %p2227_p12 = pneg %p2455_p11  ;;  %p2245_p7 = scmp.lt.s32.totalorder %s2236_s24, %s2236_s24 }
  0x18   : > { %p2239_p0 = pnand %p2237_p13, %p2227_p12  ;;  %p2246_p10 = por %p2245_p7, %p2244_p5 }
  0x1a   : > { %p2240_p3 = pneg %p2239_p0 }
  0x1c   : > { %p2247_p2 = pnand %p2246_p10, %p2240_p3 }
  0x1e   : > { %2250 = shalt.err (!%p2247_p2)
}
  0x1f   : > { %s2917_s25 = smov 64   ;;  %s2919_s26 = smov 4  }
  0x20   : > { %s2930_s1 = sld [smem:[#allocation13_spill]]  ;;  %p209_p2 = scmp.eq.s32.totalorder %s208_s23, 0 }
  0x21   : > { %p218_p9 = scmp.ne.s32.totalorder %s2343_s11, %s2339_s10  ;;  %p219_p10 = scmp.eq.s32.totalorder %s2347_s12, 0 }
  0x22   : > { %p2149_p12 = scmp.lt.s32.totalorder %s2347_s12, 2  ;;  %p2931_p0 = scmp.eq.s32.totalorder %s2427_s13, 1 }
  0x23   : > { %s2480_s29 = scalar_select %p209_p2, %s2343_s11, %s211_s22  }
  0x24   : > { %p220_p13 = por %p219_p10, %p218_p9  ;;  %p2484_p3 = por %p2931_p0, %p218_p9 }
  0x25   : > { %s320_s18 = sand.u32 1, %s2343_s11   ;;  %s1756_s20 = sshll.u32 %s2347_s12, 11 }
  0x26   : > { %2139 = dma.hbm_to_vmem [thread:$0]  (!%p2455_p11), %s2930_s1, 512, %s274_s19, [#allocation3], %s2917_s25, %s2917_s25, %s2919_s26  }
  0x27   : > { %s2932_s14 = scalar_select %p2484_p3, 1, 0 }
  0x28   : > { %s1685_s24 = sshll.u32 %s320_s18, 7  ;;  %s2493_s27 = scalar_lea.hbm %s2912_s8, %s1756_s20 }
  0x29   : > { %s324_s19 = scalar_lea.vmem [#allocation5], %s1685_s24  ;;  %p2495_p11 = pnand %p2149_p12, %p220_p13 }
  0x2a   : > { %s331_s22 = sshll.u32 %s324_s19, 4  ;;  %s2501_s28 = scalar_lea.sflag [#allocation6], %s320_s18  ;;  %s2499_s22 = int_to_ptr.vmem [resolvable:$true] %s331_s22 }
  0x2b   : > { %s2251_s25 = scalar_lea.hbm %s2493_s27, 2048  ;;  %p2253_p7 = pneg %p2495_p11 }
  0x2c   : > { %p2252_p5 = scmp.ne.s32.totalorder %s2493_s27, %s2251_s25  ;;  %s2256_s20 = scalar_lea.hbm %s2912_s8, 4096 }
  0x2d   : > { %p2257_p10 = scmp.lt.s32.totalorder %s2493_s27, %s2912_s8  ;;  %p2258_p12 = scmp.lt.s32.totalorder %s2256_s20, %s2251_s25 }
  0x2e   : > { %p2254_p2 = pnand %p2253_p7, %p2252_p5 }
  0x2f   : > { %p2259_p13 = por %p2258_p12, %p2257_p10 }
  0x30   : > { %p2255_p9 = pneg %p2254_p2 }
  0x32   : > { %p2260_p0 = pnand %p2259_p13, %p2255_p9 }
  0x34   : > { %2263 = shalt.err (!%p2260_p0)
}
  0x35   : > { %s2264_s18 = scalar_lea.vmem %s2499_s22, 2048  ;;  %s2352_s26 = smov [#allocation5]  }
  0x36   : > { %p2265_p1 = scmp.ne.s32.totalorder %s2499_s22, %s2264_s18  ;;  %s2269_s1 = sshll.u32 %s2352_s26, 4  ;;  %s2270_s1 = int_to_ptr.vmem [resolvable:$false] %s2269_s1 }
  0x37   : > { %s2271_s16 = scalar_lea.vmem %s2270_s1, 4096  ;;  %p2272_p2 = scmp.lt.s32.totalorder %s2499_s22, %s2270_s1 }
  0x38   : > { %p2267_p6 = pnand %p2265_p1, %p2253_p7  ;;  %p2273_p3 = scmp.lt.s32.totalorder %s2271_s16, %s2264_s18 }
  0x3a   : > { %p2268_p5 = pneg %p2267_p6  ;;  %p2274_p4 = por %p2273_p3, %p2272_p2 }
  0x3c   : > { %p2275_p8 = pnand %p2274_p4, %p2268_p5 }
  0x3e   : > { %2278 = shalt.err (!%p2275_p8)
}
  0x3f   : > { %s2934_s25 = smov 4   ;;  %s2935_s21 = smov 64  }
  0x40   : > { %2143 = dma.hbm_to_vmem [thread:$0]  (!%p2495_p11), %s2493_s27, 2048, %s2499_s22, %s2501_s28, %s2935_s21, %s2935_s21, %s2934_s25  }
  0x41   : > { %p2936_p1 = scmp.ne.s32.totalorder %s2927_s17, 0 }
  0x42   : > { %p2937_p6 = scmp.eq.s32.totalorder (!%p2936_p1), %s2427_s13, 0 }
  0x43   : > { %343 = sbr.rel (%p2936_p1) target bundleno = 781 (0x30d), region = 56 }
  0x48   : > { %2322 = dma.done.wait (%p2937_p6), [#allocation3], 512   ;;  %p2938_p7 = pmov %p2937_p6 }
  0x49   : > { %s2532_s1 = sand.u32 1, %s2339_s10   ;;  %p2939_p4 = scmp.ne.s32.totalorder %s2924_s15, 0 }
  0x4a   : > { %2324 = vsyncadd (%p2938_p7), [#allocation3], 4294966784  ;;  %s1690_s26 = sshll.u32 %s2532_s1, 7  ;;  %s350_s23 = scalar_lea.sflag [#allocation6], %s2532_s1 }
  0x4b   : > { %s2536_s20 = scalar_lea.vmem [#allocation5], %s1690_s26 }
  0x4c   : > { %2326 = dma.done.wait (%p2939_p4), %s350_s23, 2048  }
  0x4d   : > { %2328 = vsyncadd (%p2939_p4), %s350_s23, 4294965248  ;;  %s1692_s17 = sshll.u32 %s2427_s13, 5  ;;  %v2189_v0 = vld [vmem:[#allocation2 + $0x18] sm:$0xff]   ;;  %v2190_v1 = vld [vmem:[#allocation2 + $0x10] sm:$0xff]   ;;  %vm564_vm0 = vcmask 523264   ;;  %s1757_s23 = sshll.u32 %s2427_s13, 12 }
  0x4e   : > { %p399_p8 = scmp.lt.s32.totalorder %s1692_s17, 63  ;;  %1984 = vmatprep.subr.bf16.mxu0 %v2189_v0  ;;  %2120 = vmatprep.subr.bf16.mxu1 %v2189_v0  ;;  %v2191_v2 = vld [vmem:[#allocation2 + $0x8] sm:$0xff]   ;;  %v2192_v4 = vld [vmem:[#allocation2] sm:$0xff]   ;;  %v2209_v11 = vld [vmem:[%s2907_s3 + $0x38] sm:$0xff]   ;;  %s2856_s28 = scalar_lea.hbm %s2913_s9, %s1757_s23 }
  0x4f   : > { %1985 = vmatpush3.bf16.msra.mxu0 %v2189_v0  ;;  %2124 = vmatpush3.bf16.msra.mxu1 %v2189_v0  ;;  %v2210_v13 = vld [vmem:[%s2907_s3 + $0x30] sm:$0xff]   ;;  %v2211_v16 = vld [vmem:[%s2907_s3 + $0x28] sm:$0xff]   ;;  %v2212_v17 = vld [vmem:[%s2907_s3 + $0x20] sm:$0xff]   ;;  %s1559_s13 = scalar_lea.sflag [#allocation4], %s2532_s1  ;;  %p2940_p11 = scmp.ne.s32.totalorder %s2932_s14, 0 }
  0x50   : > { %s2949_s17 = smov (!%p399_p8, %s1692_s17), 63  ;;  %1986 = vmatprep.subr.bf16.mxu0 %v2190_v1  ;;  %2121 = vmatprep.subr.bf16.mxu1 %v2190_v1  ;;  %v2213_v22 = vld [vmem:[%s2907_s3 + $0x18] sm:$0xff]   ;;  %v2214_v25 = vld [vmem:[%s2907_s3 + $0x10] sm:$0xff]   ;;  %v2215_v26 = vld [vmem:[%s2907_s3 + $0x8] sm:$0xff]   ;;  %s2353_s19 = smov [#allocation7]  }
  0x51   : > { %s1693_s27 = sshll.u32 %s2949_s17, 2  ;;  %v2216_v27 = vld [vmem:[%s2907_s3] sm:$0xff]   ;;  %v2217_v28 = vld [vmem:[%s2909_s5 + $0x38] sm:$0xff]   ;;  %v2218_v29 = vld [vmem:[%s2909_s5 + $0x30] sm:$0xff]   ;;  %s2283_s18 = sshll.u32 %s2353_s19, 4  ;;  %s2284_s18 = int_to_ptr.vmem [resolvable:$false] %s2283_s18 }
  0x52   : > { %s2551_s24 = scalar_lea.vmem %s2904_s0, %s1693_s27  ;;  %v2219_v30 = vld [vmem:[%s2909_s5 + $0x28] sm:$0xff]   ;;  %v2220_v31 = vld [vmem:[%s2909_s5 + $0x20] sm:$0xff]   ;;  %v2221_v32 = vld [vmem:[%s2909_s5 + $0x18] sm:$0xff]   ;;  %s2636_s22 = scalar_lea.vmem %s2911_s7, %s1693_s27 }
  0x53   : > { %v2193_v3 = vld [vmem:[%s2551_s24] sm:$0xff]   ;;  %1987 = vmatpush3.bf16.msra.mxu0 %v2190_v1  ;;  %2125 = vmatpush3.bf16.msra.mxu1 %v2190_v1  ;;  %v2194_v5 = vld [vmem:[%s2551_s24 + $0x8] sm:$0xff]   ;;  %v2195_v7 = vld [vmem:[%s2551_s24 + $0x10] sm:$0xff]   ;;  %s2285_s16 = scalar_lea.vmem %s2284_s18, 8192 }
  0x54   : > { %1992 = vmatprep.mubr.msk.bf16.mxu0 %vm564_vm0, %v2193_v3  ;;  %1988 = vmatprep.subr.bf16.mxu0 %v2191_v2  ;;  %v2201_v6 = vld [vmem:[%s2551_s24 + $0x40] sm:$0xff]   ;;  %v2202_v8 = vld [vmem:[%s2551_s24 + $0x48] sm:$0xff]   ;;  %v2203_v9 = vld [vmem:[%s2551_s24 + $0x50] sm:$0xff]  }
  0x55   : > { %2122 = vmatprep.subr.bf16.mxu1 %v2191_v2  ;;  %2008 = vmatprep.mubr.msk.bf16.mxu1 %vm564_vm0, %v2201_v6  ;;  %v2196_v10 = vld [vmem:[%s2551_s24 + $0x18] sm:$0xff]   ;;  %v2197_v12 = vld [vmem:[%s2551_s24 + $0x20] sm:$0xff]   ;;  %v2198_v18 = vld [vmem:[%s2551_s24 + $0x28] sm:$0xff]  }
  0x56   : > { %v2204_v14 = vld [vmem:[%s2551_s24 + $0x58] sm:$0xff]   ;;  %v2205_v15 = vld [vmem:[%s2551_s24 + $0x60] sm:$0xff]   ;;  %v2206_v19 = vld [vmem:[%s2551_s24 + $0x68] sm:$0xff]  }
  0x57   : > { %1989 = vmatpush3.bf16.msra.mxu0 %v2191_v2  ;;  %2126 = vmatpush3.bf16.msra.mxu1 %v2191_v2  ;;  %v2199_v20 = vld [vmem:[%s2551_s24 + $0x30] sm:$0xff]   ;;  %v2200_v23 = vld [vmem:[%s2551_s24 + $0x38] sm:$0xff]   ;;  %v2629_v35 = vld [vmem:[%s2906_s2] ss:$0 sm:$0xff] }
  0x58   : > { %1990 = vmatprep.subr.bf16.mxu0 %v2192_v4  ;;  %2123 = vmatprep.subr.bf16.mxu1 %v2192_v4  ;;  %v2207_v21 = vld [vmem:[%s2551_s24 + $0x70] sm:$0xff]   ;;  %v2208_v24 = vld [vmem:[%s2551_s24 + $0x78] sm:$0xff]   ;;  %v1759_v39 = vld [vmem:[%s2636_s22] sm:$0xff]  }
  0x59   : > { %v1886_v43 = vld [vmem:[%s2636_s22 + $0x8] sm:$0xff]   ;;  %v1760_v45 = vunpack.c.l.bf16 %v1759_v39  ;;  %v1761_v52 = vunpack.c.h.bf16 %v1759_v39  ;;  %v1887_v0 = vld [vmem:[%s2636_s22 + $0x10] sm:$0xff]  }
  0x5a   : > { %v1765_v46 = vunpack.c.h.bf16 %v1886_v43  ;;  %v1764_v54 = vunpack.c.l.bf16 %v1886_v43 }
  0x5b   : > { %1991 = vmatpush3.bf16.msra.mxu0 %v2192_v4  ;;  %2127 = vmatpush3.bf16.msra.mxu1 %v2192_v4 }
  0x5c   : > { %2024 = vmatprep.subr.bf16.mxu1 %v2209_v11  ;;  %2072 = vmatprep.subr.bf16.mxu0 %v2217_v28 }
  0x5e   : > { %1993 = vmatmul.mubr.msk.bf16.vlgmr.msra.gmra.mxu0 %vm564_vm0, %v2194_v5  ;;  %2009 = vmatmul.mubr.msk.bf16.vlgmr.msra.gmra.mxu1 %vm564_vm0, %v2202_v8  ;;  %v1888_v5 = vld [vmem:[%s2636_s22 + $0x18] sm:$0xff]  }
  0x5f   : > { %1996 = vmatprep.mubr.msk.bf16.mxu0 %vm564_vm0, %v2195_v7  ;;  %2012 = vmatprep.mubr.msk.bf16.mxu1 %vm564_vm0, %v2203_v9  ;;  %v1768_v9 = vunpack.c.l.bf16 %v1887_v0 }
  0x60   : > { %2025 = vmatpush3.bf16.msra.mxu1 %v2209_v11  ;;  %2073 = vmatpush3.bf16.msra.mxu0 %v2217_v28 }
  0x61   : > { %2026 = vmatprep.subr.bf16.mxu1 %v2210_v13  ;;  %2074 = vmatprep.subr.bf16.mxu0 %v2218_v29 }
  0x64   : > { %2027 = vmatpush3.bf16.msra.mxu1 %v2210_v13  ;;  %2075 = vmatpush3.bf16.msra.mxu0 %v2218_v29 }
  0x65   : > { %2028 = vmatprep.subr.bf16.mxu1 %v2211_v16  ;;  %2076 = vmatprep.subr.bf16.mxu0 %v2219_v30 }
  0x66   : > { %1997 = vmatmul.mubr.msk.bf16.gmra.mxu0 %vm564_vm0, %v2196_v10  ;;  %2013 = vmatmul.mubr.msk.bf16.gmra.mxu1 %vm564_vm0, %v2204_v14  ;;  %v1773_v10 = vunpack.c.h.bf16 %v1888_v5 }
  0x67   : > { %2000 = vmatprep.mubr.msk.bf16.mxu0 %vm564_vm0, %v2197_v12  ;;  %2016 = vmatprep.mubr.msk.bf16.mxu1 %vm564_vm0, %v2205_v15 }
  0x68   : > { %2029 = vmatpush3.bf16.msra.mxu1 %v2211_v16  ;;  %2077 = vmatpush3.bf16.msra.mxu0 %v2219_v30  ;;  %v1769_v16 = vunpack.c.h.bf16 %v1887_v0 }
  0x69   : > { %2030 = vmatprep.subr.bf16.mxu1 %v2212_v17  ;;  %2078 = vmatprep.subr.bf16.mxu0 %v2220_v31 }
  0x6c   : > { %2031 = vmatpush3.bf16.msra.mxu1 %v2212_v17  ;;  %2079 = vmatpush3.bf16.msra.mxu0 %v2220_v31  ;;  %v1890_v31 = vld [vmem:[%s2636_s22 + $0x28] sm:$0xff]  }
  0x6d   : > { %2032 = vmatprep.subr.bf16.mxu1 %v2213_v22  ;;  %2080 = vmatprep.subr.bf16.mxu0 %v2221_v32 }
  0x6e   : > { %2001 = vmatmul.mubr.msk.bf16.gmra.mxu0 %vm564_vm0, %v2198_v18  ;;  %2017 = vmatmul.mubr.msk.bf16.gmra.mxu1 %vm564_vm0, %v2206_v19  ;;  %v1772_v18 = vunpack.c.l.bf16 %v1888_v5  ;;  %v1892_v5 = vld [vmem:[%s2636_s22 + $0x38] sm:$0xff]  }
  0x6f   : > { %2004 = vmatprep.mubr.msk.bf16.mxu0 %vm564_vm0, %v2199_v20  ;;  %2020 = vmatprep.mubr.msk.bf16.mxu1 %vm564_vm0, %v2207_v21 }
  0x70   : > { %2033 = vmatpush3.bf16.msra.mxu1 %v2213_v22  ;;  %2081 = vmatpush3.bf16.msra.mxu0 %v2221_v32 }
  0x71   : > { %2034 = vmatprep.subr.bf16.mxu1 %v2214_v25 }
  0x74   : > { %2035 = vmatpush3.bf16.msra.mxu1 %v2214_v25 }
  0x75   : > { %2036 = vmatprep.subr.bf16.mxu1 %v2215_v26 }
  0x76   : > { %2005 = vmatmul.mubr.msk.bf16.gmra.mxu0 %vm564_vm0, %v2200_v23  ;;  %2021 = vmatmul.mubr.msk.bf16.gmra.mxu1 %vm564_vm0, %v2208_v24 }
  0x78   : > { %2037 = vmatpush3.bf16.msra.mxu1 %v2215_v26 }
  0x79   : > { %2038 = vmatprep.subr.bf16.mxu1 %v2216_v27 }
  0x7c   : > { %2039 = vmatpush3.bf16.msra.mxu1 %v2216_v27  ;;  %v1889_v27 = vld [vmem:[%s2636_s22 + $0x20] sm:$0xff]  }
 0x11e   : > { %v1994_v33 = vpop.f32.mrf.mxu0  ;;  %v2624_v34 = vpop.f32.mrf.mxu1 }
 0x11f   : > { %v656_v40 = vadd.f32 %v1994_v33, %v2629_v35 }
 0x120   : > { %v647_v36 = vpop.f32.mrf.mxu0  ;;  %v2638_v37 = vpop.f32.mrf.mxu1 }
 0x121   : > { %v648_v38 = vadd.f32 %v2629_v35, %v647_v36  ;;  %v776_v53 = vmax.f32 %v656_v40, 0.0  ;;  %v1776_v36 = vunpack.c.l.bf16 %v1889_v27 }
 0x122   : > { %v1995_v41 = vpop.f32.mrf.mxu0  ;;  %v2643_v42 = vpop.f32.mrf.mxu1 }
 0x123   : > { %v659_v44 = vadd.f32 %v1995_v41, %v2629_v35  ;;  %v774_v49 = vmax.f32 %v648_v38, 0.0  ;;  %v872_v1 = vmul.f32 %v1764_v54, %v776_v53  ;;  %v1781_v38 = vunpack.c.h.bf16 %v1890_v31  ;;  %v1893_v53 = vld [vmem:[%s2636_s22 + $0x40] sm:$0xff]  }
 0x124   : > { %v650_v47 = vpop.f32.mrf.mxu0  ;;  %v2647_v48 = vpop.f32.mrf.mxu1 }
 0x125   : > { %v777_v50 = vmax.f32 %v659_v44, 0.0  ;;  %v651_v51 = vadd.f32 %v2629_v35, %v650_v47  ;;  %v870_v61 = vmul.f32 %v1760_v45, %v774_v49  ;;  %v1780_v49 = vunpack.c.l.bf16 %v1890_v31 }
 0x126   : > { %v1998_v55 = vpop.f32.mrf.mxu0  ;;  %v2650_v56 = vpop.f32.mrf.mxu1  ;;  %v715_v54 = vadd.f32 %v2629_v35, %v2647_v48  ;;  %v723_v31 = vadd.f32 %v2643_v42, %v2629_v35  ;;  %v1896_v42 = vld [vmem:[%s2636_s22 + $0x58] sm:$0xff]  }
 0x127   : > { %v775_v57 = vmax.f32 %v651_v51, 0.0  ;;  %v873_v58 = vmul.f32 %v1765_v46, %v777_v50  ;;  %v672_v2 = vadd.f32 %v1998_v55, %v2629_v35  ;;  %v1777_v46 = vunpack.c.h.bf16 %v1889_v27  ;;  %v1895_v27 = vld [vmem:[%s2636_s22 + $0x50] sm:$0xff]  }
 0x128   : > { %v663_v59 = vpop.f32.mrf.mxu0  ;;  %v2652_v60 = vpop.f32.mrf.mxu1  ;;  %v712_v51 = vadd.f32 %v2629_v35, %v2638_v37  ;;  %v791_v48 = vmax.f32 %v715_v54, 0.0  ;;  %v1897_v54 = vld [vmem:[%s2636_s22 + $0x60] sm:$0xff]  }
 0x129   : > { %v871_v62 = vmul.f32 %v1761_v52, %v775_v57  ;;  %v664_v63 = vadd.f32 %v2629_v35, %v663_v59  ;;  %v903_v8 = vpack.c.bf16 %v873_v58, %v872_v1  ;;  %v780_v17 = vmax.f32 %v672_v2, 0.0 }
 0x12a   : > { %v1999_v3 = vpop.f32.mrf.mxu0  ;;  %v2657_v4 = vpop.f32.mrf.mxu1  ;;  %v790_v37 = vmax.f32 %v712_v51, 0.0 }
 0x12b   : > { %v675_v6 = vadd.f32 %v1999_v3, %v2629_v35  ;;  %v902_v7 = vpack.c.bf16 %v871_v62, %v870_v61  ;;  %v778_v13 = vmax.f32 %v664_v63, 0.0  ;;  %v876_v28 = vmul.f32 %v1772_v18, %v780_v17  ;;  %v1891_v63 = vld [vmem:[%s2636_s22 + $0x30] sm:$0xff]  }
 0x12c   : > { %v666_v11 = vpop.f32.mrf.mxu0  ;;  %v2661_v12 = vpop.f32.mrf.mxu1  ;;  %v1792_v3 = vunpack.c.l.bf16 %v1893_v53  ;;  %v1785_v18 = vunpack.c.h.bf16 %v1891_v63 }
 0x12d   : > { %v781_v14 = vmax.f32 %v675_v6, 0.0  ;;  %v667_v15 = vadd.f32 %v2629_v35, %v666_v11  ;;  %2040 = vmatprep.mubr.bf16.mxu1 %v902_v7  ;;  %v874_v24 = vmul.f32 %v1768_v9, %v778_v13  ;;  %v1784_v9 = vunpack.c.l.bf16 %v1891_v63 }
 0x12e   : > { %v2002_v19 = vpop.f32.mrf.mxu0  ;;  %2041 = vmatmul.mubr.bf16.vlgmr.msra.gmra.mxu1 %v903_v8  ;;  %v2664_v23 = vpop.f32.mrf.mxu1  ;;  %v1793_v8 = vunpack.c.h.bf16 %v1893_v53 }
 0x12f   : > { %v779_v20 = vmax.f32 %v667_v15, 0.0  ;;  %v877_v21 = vmul.f32 %v1773_v10, %v781_v14  ;;  %v688_v29 = vadd.f32 %v2002_v19, %v2629_v35  ;;  %v1789_v10 = vunpack.c.h.bf16 %v1892_v5 }
 0x130   : > { %v679_v22 = vpop.f32.mrf.mxu0  ;;  %v2671_v41 = vpop.f32.mrf.mxu1 }
 0x131   : > { %v875_v25 = vmul.f32 %v1769_v16, %v779_v20  ;;  %v680_v26 = vadd.f32 %v2629_v35, %v679_v22  ;;  %v905_v40 = vpack.c.bf16 %v877_v21, %v876_v28  ;;  %v784_v47 = vmax.f32 %v688_v29, 0.0  ;;  %v1894_v22 = vld [vmem:[%s2636_s22 + $0x48] sm:$0xff]  }
 0x132   : > { %v2003_v30 = vpop.f32.mrf.mxu0  ;;  %v2679_v58 = vpop.f32.mrf.mxu1  ;;  %v1788_v20 = vunpack.c.l.bf16 %v1892_v5  ;;  %v886_v21 = vmul.f32 %v1792_v3, %v790_v37  ;;  %v731_v28 = vadd.f32 %v2629_v35, %v2661_v12  ;;  %v720_v29 = vadd.f32 %v2624_v34, %v2629_v35 }
 0x133   : > { %v691_v32 = vadd.f32 %v2003_v30, %v2629_v35  ;;  %v904_v33 = vpack.c.bf16 %v875_v25, %v874_v24  ;;  %v782_v43 = vmax.f32 %v680_v26, 0.0  ;;  %v880_v0 = vmul.f32 %v1780_v49, %v784_v47 }
 0x134   : > { %v682_v39 = vpop.f32.mrf.mxu0  ;;  %v746_v14 = vpop.f32.mrf.mxu1  ;;  %v887_v25 = vmul.f32 %v1793_v8, %v791_v48  ;;  %v728_v26 = vadd.f32 %v2629_v35, %v2652_v60  ;;  %v1801_v60 = vunpack.c.h.bf16 %v1895_v27  ;;  %v795_v12 = vmax.f32 %v731_v28, 0.0 }
 0x135   : > { %v785_v44 = vmax.f32 %v691_v32, 0.0  ;;  %v683_v45 = vadd.f32 %v2629_v35, %v682_v39  ;;  %2044 = vmatprep.mubr.bf16.mxu1 %v904_v33  ;;  %v878_v59 = vmul.f32 %v1776_v36, %v782_v43  ;;  %v1796_v39 = vunpack.c.l.bf16 %v1894_v22 }
 0x136   : > { %v2006_v50 = vpop.f32.mrf.mxu0  ;;  %2045 = vmatmul.mubr.bf16.gmra.mxu1 %v905_v40  ;;  %v2697_v32 = vpop.f32.mrf.mxu1  ;;  %v1800_v40 = vunpack.c.l.bf16 %v1895_v27  ;;  %v794_v43 = vmax.f32 %v728_v26, 0.0  ;;  %v793_v34 = vmax.f32 %v723_v31, 0.0  ;;  %v1797_v47 = vunpack.c.h.bf16 %v1894_v22 }
 0x137   : > { %v783_v52 = vmax.f32 %v683_v45, 0.0  ;;  %v881_v55 = vmul.f32 %v1781_v38, %v785_v44  ;;  %v704_v1 = vadd.f32 %v2006_v50, %v2629_v35  ;;  %v910_v45 = vpack.c.bf16 %v887_v25, %v886_v21 }
 0x138   : > { %v695_v57 = vpop.f32.mrf.mxu0  ;;  %v759_v50 = vpop.f32.mrf.mxu1  ;;  %v890_v51 = vmul.f32 %v1800_v40, %v794_v43  ;;  %v744_v53 = vadd.f32 %v2629_v35, %v2671_v41  ;;  %v1809_v3 = vunpack.c.h.bf16 %v1897_v54 }
 0x139   : > { %v879_v61 = vmul.f32 %v1777_v46, %v783_v52  ;;  %v696_v62 = vadd.f32 %v2629_v35, %v695_v57  ;;  %v907_v13 = vpack.c.bf16 %v881_v55, %v880_v0  ;;  %v788_v19 = vmax.f32 %v704_v1, 0.0 }
 0x13a   : > { %v2007_v2 = vpop.f32.mrf.mxu0  ;;  %v792_v46 = vmax.f32 %v720_v29, 0.0  ;;  %v891_v52 = vmul.f32 %v1801_v60, %v795_v12  ;;  %v747_v55 = vadd.f32 %v2629_v35, %v746_v14  ;;  %v2023_v63 = vpop.f32.mrf.mxu1  ;;  %v1804_v0 = vunpack.c.l.bf16 %v1896_v42 }
 0x13b   : > { %v707_v6 = vadd.f32 %v2007_v2, %v2629_v35  ;;  %v906_v7 = vpack.c.bf16 %v879_v61, %v878_v59  ;;  %v786_v15 = vmax.f32 %v696_v62, 0.0  ;;  %v884_v38 = vmul.f32 %v1788_v20, %v788_v19 }
 0x13c   : > { %v698_v11 = vpop.f32.mrf.mxu0  ;;  %v888_v57 = vmul.f32 %v1796_v39, %v792_v46  ;;  %v889_v59 = vmul.f32 %v1797_v47, %v793_v34  ;;  %v736_v61 = vadd.f32 %v2650_v56, %v2629_v35  ;;  %v739_v62 = vadd.f32 %v2657_v4, %v2629_v35  ;;  %v762_v8 = vpop.f32.mrf.mxu1  ;;  %v2224_v34 = vld [vmem:[%s2909_s5] sm:$0xff]  }
 0x13d   : > { %v789_v16 = vmax.f32 %v707_v6, 0.0  ;;  %v699_v17 = vadd.f32 %v2629_v35, %v698_v11  ;;  %2048 = vmatprep.mubr.bf16.mxu1 %v906_v7  ;;  %v882_v33 = vmul.f32 %v1784_v9, %v786_v15  ;;  %v1808_v1 = vunpack.c.l.bf16 %v1897_v54  ;;  %v1898_v9 = vld [vmem:[%s2636_s22 + $0x68] sm:$0xff]   ;;  %v1899_v11 = vld [vmem:[%s2636_s22 + $0x70] sm:$0xff]  }
 0x13e   : > { %2049 = vmatmul.mubr.bf16.gmra.mxu1 %v907_v13  ;;  %v798_v2 = vmax.f32 %v744_v53, 0.0  ;;  %v799_v37 = vmax.f32 %v747_v55, 0.0  ;;  %v912_v41 = vpack.c.bf16 %v891_v52, %v890_v51  ;;  %v796_v5 = vmax.f32 %v736_v61, 0.0  ;;  %v1823_v51 = vld [vmem:[%s2536_s20] sm:$0xff]   ;;  %v1901_v54 = vld [vmem:[%s2536_s20 + $0x8] sm:$0xff]  }
 0x13f   : > { %v787_v24 = vmax.f32 %v699_v17, 0.0  ;;  %v885_v30 = vmul.f32 %v1789_v10, %v789_v16  ;;  %v797_v6 = vmax.f32 %v739_v62, 0.0  ;;  %v1805_v7 = vunpack.c.h.bf16 %v1896_v42 }
 0x140   : > { %v911_v48 = vpack.c.bf16 %v889_v59, %v888_v57  ;;  %v894_v10 = vmul.f32 %v1808_v1, %v798_v2  ;;  %v895_v56 = vmul.f32 %v1809_v3, %v799_v37  ;;  %v760_v4 = vadd.f32 %v2629_v35, %v759_v50 }
 0x141   : > { %v883_v36 = vmul.f32 %v1785_v18, %v787_v24  ;;  %v909_v49 = vpack.c.bf16 %v885_v30, %v884_v38  ;;  %v763_v13 = vadd.f32 %v2629_v35, %v762_v8  ;;  %v892_v14 = vmul.f32 %v1804_v0, %v796_v5 }
 0x142   : > { %v893_v15 = vmul.f32 %v1805_v7, %v797_v6  ;;  %v752_v16 = vadd.f32 %v2664_v23, %v2629_v35  ;;  %v755_v17 = vadd.f32 %v2679_v58, %v2629_v35  ;;  %v1812_v18 = vunpack.c.l.bf16 %v1898_v9 }
 0x143   : > { %v908_v44 = vpack.c.bf16 %v883_v36, %v882_v33  ;;  %v1816_v19 = vunpack.c.l.bf16 %v1899_v11  ;;  %v802_v20 = vmax.f32 %v760_v4, 0.0  ;;  %v803_v21 = vmax.f32 %v763_v13, 0.0  ;;  %v1900_v33 = vld [vmem:[%s2636_s22 + $0x78] sm:$0xff]  }
 0x144   : > { %v1817_v22 = vunpack.c.h.bf16 %v1899_v11  ;;  %v914_v24 = vpack.c.bf16 %v895_v56, %v894_v10  ;;  %v800_v25 = vmax.f32 %v752_v16, 0.0  ;;  %v801_v26 = vmax.f32 %v755_v17, 0.0  ;;  %v1903_v11 = vld [vmem:[%s2536_s20 + $0x18] sm:$0xff]  }
 0x145   : > { %2052 = vmatprep.mubr.bf16.mxu1 %v908_v44  ;;  %v1813_v27 = vunpack.c.h.bf16 %v1898_v9  ;;  %v913_v28 = vpack.c.bf16 %v893_v15, %v892_v14  ;;  %v898_v29 = vmul.f32 %v1816_v19, %v802_v20  ;;  %v768_v58 = vadd.f32 %v2697_v32, %v2629_v35  ;;  %v2222_v32 = vld [vmem:[%s2909_s5 + $0x10] sm:$0xff]  }
 0x146   : > { %2053 = vmatmul.mubr.bf16.gmra.mxu1 %v909_v49  ;;  %v899_v30 = vmul.f32 %v1817_v22, %v803_v21  ;;  %v896_v31 = vmul.f32 %v1812_v18, %v800_v25  ;;  %v771_v36 = vadd.f32 %v2023_v63, %v2629_v35  ;;  %v1820_v38 = vunpack.c.l.bf16 %v1900_v33  ;;  %2082 = vmatprep.subr.bf16.mxu0 %v2222_v32  ;;  %v2223_v35 = vld [vmem:[%s2909_s5 + $0x8] sm:$0xff]   ;;  %v2732_v49 = vld [vmem:[%s2908_s4] ss:$0 sm:$0xff]  ;;  %v1902_v9 = vld [vmem:[%s2536_s20 + $0x10] sm:$0xff]  }
 0x147   : > { %2056 = vmatprep.mubr.bf16.mxu1 %v910_v45  ;;  %v897_v23 = vmul.f32 %v1813_v27, %v801_v26  ;;  %v804_v40 = vmax.f32 %v768_v58, 0.0  ;;  %v1821_v43 = vunpack.c.h.bf16 %v1900_v33  ;;  %2083 = vmatpush3.bf16.msra.mxu0 %v2222_v32  ;;  %v1824_v57 = vunpack.c.l.bf16 %v1823_v51  ;;  %v1904_v58 = vld [vmem:[%s2536_s20 + $0x20] sm:$0xff]  }
 0x148   : > { %v916_v39 = vpack.c.bf16 %v899_v30, %v898_v29  ;;  %v805_v60 = vmax.f32 %v771_v36, 0.0  ;;  %2084 = vmatprep.subr.bf16.mxu0 %v2223_v35  ;;  %v1829_v59 = vunpack.c.h.bf16 %v1901_v54  ;;  %v1825_v1 = vunpack.c.h.bf16 %v1823_v51 }
 0x149   : > { %v915_v44 = vpack.c.bf16 %v897_v23, %v896_v31  ;;  %v900_v12 = vmul.f32 %v1820_v38, %v804_v40  ;;  %v1828_v37 = vunpack.c.l.bf16 %v1901_v54  ;;  %v1832_v16 = vunpack.c.l.bf16 %v1902_v9 }
 0x14a   : > { %v901_v45 = vmul.f32 %v1821_v43, %v805_v60  ;;  %v1837_v17 = vunpack.c.h.bf16 %v1903_v11  ;;  %v1833_v22 = vunpack.c.h.bf16 %v1902_v9  ;;  %v1836_v25 = vunpack.c.l.bf16 %v1903_v11 }
 0x14b   : > { %2085 = vmatpush3.bf16.msra.mxu0 %v2223_v35  ;;  %v1840_v43 = vunpack.c.l.bf16 %v1904_v58 }
 0x14c   : > { %v917_v46 = vpack.c.bf16 %v901_v45, %v900_v12  ;;  %2086 = vmatprep.subr.bf16.mxu0 %v2224_v34 }
 0x14e   : > { %2057 = vmatmul.mubr.bf16.gmra.mxu1 %v911_v48 }
 0x14f   : > { %2060 = vmatprep.mubr.bf16.mxu1 %v912_v41  ;;  %2087 = vmatpush3.bf16.msra.mxu0 %v2224_v34  ;;  %v1841_v34 = vunpack.c.h.bf16 %v1904_v58 }
 0x156   : > { %2061 = vmatmul.mubr.bf16.gmra.mxu1 %v913_v28 }
 0x157   : > { %2064 = vmatprep.mubr.bf16.mxu1 %v914_v24 }
 0x15e   : > { %2065 = vmatmul.mubr.bf16.gmra.mxu1 %v915_v44 }
 0x15f   : > { %2068 = vmatprep.mubr.bf16.mxu1 %v916_v39  ;;  %v1905_v39 = vld [vmem:[%s2536_s20 + $0x28] sm:$0xff]  }
 0x160   : > { %v1845_v44 = vunpack.c.h.bf16 %v1905_v39 }
 0x166   : > { %2069 = vmatmul.mubr.bf16.gmra.mxu1 %v917_v46 }
 0x1ee   : > { %v2042_v47 = vpop.f32.mrf.mxu1 }
 0x1ef   : > { %v1032_v52 = vadd.f32 %v2042_v47, %v2732_v49 }
 0x1f0   : > { %v1023_v50 = vpop.f32.mrf.mxu1 }
 0x1f1   : > { %v1024_v42 = vadd.f32 %v2732_v49, %v1023_v50  ;;  %v1152_v2 = vmax.f32 %v1032_v52, 0.0  ;;  %v1844_v50 = vunpack.c.l.bf16 %v1905_v39 }
 0x1f2   : > { %v2043_v53 = vpop.f32.mrf.mxu1 }
 0x1f3   : > { %v1035_v55 = vadd.f32 %v2043_v53, %v2732_v49  ;;  %v1150_v62 = vmax.f32 %v1024_v42, 0.0  ;;  %v1248_v10 = vmul.f32 %v1828_v37, %v1152_v2 }
 0x1f4   : > { %v1026_v61 = vpop.f32.mrf.mxu1 }
 0x1f5   : > { %v1153_v63 = vmax.f32 %v1035_v55, 0.0  ;;  %v1027_v0 = vadd.f32 %v2732_v49, %v1026_v61  ;;  %v1246_v7 = vmul.f32 %v1824_v57, %v1150_v62 }
 0x1f6   : > { %v2046_v3 = vpop.f32.mrf.mxu1 }
 0x1f7   : > { %v1151_v41 = vmax.f32 %v1027_v0, 0.0  ;;  %v1249_v5 = vmul.f32 %v1829_v59, %v1153_v63  ;;  %v1048_v56 = vadd.f32 %v2046_v3, %v2732_v49  ;;  %v1906_v59 = vld [vmem:[%s2536_s20 + $0x30] sm:$0xff]   ;;  %v1907_v0 = vld [vmem:[%s2536_s20 + $0x38] sm:$0xff]  }
 0x1f8   : > { %v1039_v6 = vpop.f32.mrf.mxu1  ;;  %v1848_v37 = vunpack.c.l.bf16 %v1906_v59  ;;  %v1853_v3 = vunpack.c.h.bf16 %v1907_v0 }
 0x1f9   : > { %v1247_v48 = vmul.f32 %v1825_v1, %v1151_v41  ;;  %v1040_v8 = vadd.f32 %v2732_v49, %v1039_v6  ;;  %v1279_v15 = vpack.c.bf16 %v1249_v5, %v1248_v10  ;;  %v1156_v24 = vmax.f32 %v1048_v56, 0.0 }
 0x1fa   : > { %v2047_v4 = vpop.f32.mrf.mxu1  ;;  %v1852_v10 = vunpack.c.l.bf16 %v1907_v0 }
 0x1fb   : > { %v1051_v13 = vadd.f32 %v2047_v4, %v2732_v49  ;;  %v1278_v14 = vpack.c.bf16 %v1247_v48, %v1246_v7  ;;  %v1154_v19 = vmax.f32 %v1040_v8, 0.0  ;;  %v1252_v33 = vmul.f32 %v1836_v25, %v1156_v24 }
 0x1fc   : > { %v1042_v18 = vpop.f32.mrf.mxu1  ;;  %v1849_v8 = vunpack.c.h.bf16 %v1906_v59 }
 0x1fd   : > { %v1157_v20 = vmax.f32 %v1051_v13, 0.0  ;;  %v1043_v21 = vadd.f32 %v2732_v49, %v1042_v18  ;;  %2088 = vmatprep.mubr.bf16.mxu0 %v1278_v14  ;;  %v1250_v30 = vmul.f32 %v1832_v16, %v1154_v19 }
 0x1fe   : > { %v2050_v26 = vpop.f32.mrf.mxu1  ;;  %2089 = vmatmul.mubr.bf16.vlgmr.msra.gmra.mxu0 %v1279_v15 }
 0x1ff   : > { %v1155_v27 = vmax.f32 %v1043_v21, 0.0  ;;  %v1253_v28 = vmul.f32 %v1837_v17, %v1157_v20  ;;  %v1064_v36 = vadd.f32 %v2050_v26, %v2732_v49  ;;  %v1908_v17 = vld [vmem:[%s2536_s20 + $0x40] sm:$0xff]   ;;  %v1909_v21 = vld [vmem:[%s2536_s20 + $0x48] sm:$0xff]  }
 0x200   : > { %v1055_v29 = vpop.f32.mrf.mxu1  ;;  %v1856_v25 = vunpack.c.l.bf16 %v1908_v17  ;;  %v1861_v26 = vunpack.c.h.bf16 %v1909_v21 }
 0x201   : > { %v1251_v31 = vmul.f32 %v1833_v22, %v1155_v27  ;;  %v1056_v23 = vadd.f32 %v2732_v49, %v1055_v29  ;;  %v1281_v45 = vpack.c.bf16 %v1253_v28, %v1252_v33  ;;  %v1160_v47 = vmax.f32 %v1064_v36, 0.0 }
 0x202   : > { %v2051_v38 = vpop.f32.mrf.mxu1  ;;  %v1860_v33 = vunpack.c.l.bf16 %v1909_v21 }
 0x203   : > { %v1067_v40 = vadd.f32 %v2051_v38, %v2732_v49  ;;  %v1280_v60 = vpack.c.bf16 %v1251_v31, %v1250_v30  ;;  %v1158_v46 = vmax.f32 %v1056_v23, 0.0  ;;  %v1256_v61 = vmul.f32 %v1844_v50, %v1160_v47 }
 0x204   : > { %v1058_v12 = vpop.f32.mrf.mxu1  ;;  %v1857_v23 = vunpack.c.h.bf16 %v1908_v17 }
 0x205   : > { %v1161_v32 = vmax.f32 %v1067_v40, 0.0  ;;  %v1059_v35 = vadd.f32 %v2732_v49, %v1058_v12  ;;  %2092 = vmatprep.mubr.bf16.mxu0 %v1280_v60  ;;  %v1254_v54 = vmul.f32 %v1840_v43, %v1158_v46  ;;  %v1910_v12 = vld [vmem:[%s2536_s20 + $0x50] sm:$0xff]  }
 0x206   : > { %v2054_v42 = vpop.f32.mrf.mxu1  ;;  %2093 = vmatmul.mubr.bf16.gmra.mxu0 %v1281_v45  ;;  %v1864_v50 = vunpack.c.l.bf16 %v1910_v12 }
 0x207   : > { %v1159_v51 = vmax.f32 %v1059_v35, 0.0  ;;  %v1257_v52 = vmul.f32 %v1845_v44, %v1161_v32  ;;  %v1080_v62 = vadd.f32 %v2054_v42, %v2732_v49  ;;  %v1911_v35 = vld [vmem:[%s2536_s20 + $0x58] sm:$0xff]  }
 0x208   : > { %v1071_v53 = vpop.f32.mrf.mxu1  ;;  %v1869_v42 = vunpack.c.h.bf16 %v1911_v35 }
 0x209   : > { %v1255_v55 = vmul.f32 %v1841_v34, %v1159_v51  ;;  %v1072_v57 = vadd.f32 %v2732_v49, %v1071_v53  ;;  %v1283_v5 = vpack.c.bf16 %v1257_v52, %v1256_v61  ;;  %v1164_v9 = vmax.f32 %v1080_v62, 0.0 }
 0x20a   : > { %v2055_v63 = vpop.f32.mrf.mxu1  ;;  %v1868_v61 = vunpack.c.l.bf16 %v1911_v35 }
 0x20b   : > { %v1083_v1 = vadd.f32 %v2055_v63, %v2732_v49  ;;  %v1282_v2 = vpack.c.bf16 %v1255_v55, %v1254_v54  ;;  %v1162_v6 = vmax.f32 %v1072_v57, 0.0  ;;  %v1260_v18 = vmul.f32 %v1852_v10, %v1164_v9 }
 0x20c   : > { %v1074_v41 = vpop.f32.mrf.mxu1  ;;  %v1865_v57 = vunpack.c.h.bf16 %v1910_v12 }
 0x20d   : > { %v1165_v7 = vmax.f32 %v1083_v1, 0.0  ;;  %v1075_v48 = vadd.f32 %v2732_v49, %v1074_v41  ;;  %2096 = vmatprep.mubr.bf16.mxu0 %v1282_v2  ;;  %v1258_v14 = vmul.f32 %v1848_v37, %v1162_v6  ;;  %v1912_v41 = vld [vmem:[%s2536_s20 + $0x60] sm:$0xff]  }
 0x20e   : > { %v2058_v56 = vpop.f32.mrf.mxu1  ;;  %2097 = vmatmul.mubr.bf16.gmra.mxu0 %v1283_v5  ;;  %v1872_v10 = vunpack.c.l.bf16 %v1912_v41 }
 0x20f   : > { %v1163_v4 = vmax.f32 %v1075_v48, 0.0  ;;  %v1261_v11 = vmul.f32 %v1853_v3, %v1165_v7  ;;  %v1096_v19 = vadd.f32 %v2058_v56, %v2732_v49  ;;  %v1913_v48 = vld [vmem:[%s2536_s20 + $0x68] sm:$0xff]  }
 0x210   : > { %v1087_v13 = vpop.f32.mrf.mxu1  ;;  %v1877_v56 = vunpack.c.h.bf16 %v1913_v48 }
 0x211   : > { %v1259_v15 = vmul.f32 %v1849_v8, %v1163_v4  ;;  %v1088_v16 = vadd.f32 %v2732_v49, %v1087_v13  ;;  %v1285_v28 = vpack.c.bf16 %v1261_v11, %v1260_v18  ;;  %v1168_v58 = vmax.f32 %v1096_v19, 0.0 }
 0x212   : > { %v2059_v20 = vpop.f32.mrf.mxu1  ;;  %v1876_v18 = vunpack.c.l.bf16 %v1913_v48 }
 0x213   : > { %v1099_v22 = vadd.f32 %v2059_v20, %v2732_v49  ;;  %v1284_v24 = vpack.c.bf16 %v1259_v15, %v1258_v14  ;;  %v1166_v29 = vmax.f32 %v1088_v16, 0.0  ;;  %v1264_v45 = vmul.f32 %v1860_v33, %v1168_v58 }
 0x214   : > { %v1090_v27 = vpop.f32.mrf.mxu1  ;;  %v1873_v16 = vunpack.c.h.bf16 %v1912_v41 }
 0x215   : > { %v1169_v30 = vmax.f32 %v1099_v22, 0.0  ;;  %v1091_v31 = vadd.f32 %v2732_v49, %v1090_v27  ;;  %2100 = vmatprep.mubr.bf16.mxu0 %v1284_v24  ;;  %v1262_v60 = vmul.f32 %v1856_v25, %v1166_v29  ;;  %v1914_v27 = vld [vmem:[%s2536_s20 + $0x70] sm:$0xff]  }
 0x216   : > { %v2062_v36 = vpop.f32.mrf.mxu1  ;;  %2101 = vmatmul.mubr.bf16.gmra.mxu0 %v1285_v28  ;;  %v1880_v33 = vunpack.c.l.bf16 %v1914_v27 }
 0x217   : > { %v1167_v38 = vmax.f32 %v1091_v31, 0.0  ;;  %v1265_v39 = vmul.f32 %v1861_v26, %v1169_v30  ;;  %v1112_v46 = vadd.f32 %v2062_v36, %v2732_v49  ;;  %v1915_v31 = vld [vmem:[%s2536_s20 + $0x78] sm:$0xff]   ;;  %s1691_s20 = sshll.u32 %s2532_s1, 8 }
 0x218   : > { %v1103_v40 = vpop.f32.mrf.mxu1  ;;  %v1885_v36 = vunpack.c.h.bf16 %v1915_v31  ;;  %s2789_s26 = scalar_lea.vmem [#allocation7], %s1691_s20 }
 0x219   : > { %v1263_v43 = vmul.f32 %v1857_v23, %v1167_v38  ;;  %v1104_v44 = vadd.f32 %v2732_v49, %v1103_v40  ;;  %v1287_v52 = vpack.c.bf16 %v1265_v39, %v1264_v45  ;;  %v1172_v59 = vmax.f32 %v1112_v46, 0.0  ;;  %s1572_s22 = sshll.u32 %s2789_s26, 4  ;;  %s2858_s22 = int_to_ptr.vmem [resolvable:$true] %s1572_s22 }
 0x21a   : > { %v2063_v32 = vpop.f32.mrf.mxu1  ;;  %v1884_v45 = vunpack.c.l.bf16 %v1915_v31  ;;  %s2279_s15 = scalar_lea.vmem %s2858_s22, 4096  ;;  %p2286_p12 = scmp.lt.s32.totalorder %s2858_s22, %s2284_s18 }
 0x21b   : > { %v1115_v34 = vadd.f32 %v2063_v32, %v2732_v49  ;;  %v1286_v47 = vpack.c.bf16 %v1263_v43, %v1262_v60  ;;  %v1170_v53 = vmax.f32 %v1104_v44, 0.0  ;;  %v1268_v5 = vmul.f32 %v1868_v61, %v1172_v59  ;;  %p2280_p3 = scmp.ne.s32.totalorder %s2858_s22, %s2279_s15  ;;  %p2287_p13 = scmp.lt.s32.totalorder %s2285_s16, %s2279_s15 }
 0x21c   : > { %v1106_v51 = vpop.f32.mrf.mxu1  ;;  %v1881_v44 = vunpack.c.h.bf16 %v1914_v27 }
 0x21d   : > { %v1173_v54 = vmax.f32 %v1115_v34, 0.0  ;;  %v1107_v55 = vadd.f32 %v2732_v49, %v1106_v51  ;;  %2104 = vmatprep.mubr.bf16.mxu0 %v1286_v47  ;;  %v1266_v2 = vmul.f32 %v1864_v50, %v1170_v53  ;;  %v2786_v51 = vld [vmem:[%s2910_s6] ss:$0 sm:$0xff]  ;;  %p2281_p9 = pnand %p2280_p3, %p2940_p11  ;;  %p2288_p0 = por %p2287_p13, %p2286_p12 }
 0x21e   : > { %v2066_v62 = vpop.f32.mrf.mxu1  ;;  %2105 = vmatmul.mubr.bf16.gmra.mxu0 %v1287_v52 }
 0x21f   : > { %v1171_v63 = vmax.f32 %v1107_v55, 0.0  ;;  %v1269_v0 = vmul.f32 %v1869_v42, %v1173_v54  ;;  %v1128_v6 = vadd.f32 %v2066_v62, %v2732_v49  ;;  %p2282_p10 = pneg %p2281_p9 }
 0x220   : > { %v1119_v1 = vpop.f32.mrf.mxu1 }
 0x221   : > { %v1267_v37 = vmul.f32 %v1865_v57, %v1171_v63  ;;  %v1120_v3 = vadd.f32 %v2732_v49, %v1119_v1  ;;  %v1289_v11 = vpack.c.bf16 %v1269_v0, %v1268_v5  ;;  %v1176_v17 = vmax.f32 %v1128_v6, 0.0  ;;  %p2289_p5 = pnand %p2288_p0, %p2282_p10 }
 0x222   : > { %v2067_v7 = vpop.f32.mrf.mxu1 }
 0x223   : > { %v1131_v8 = vadd.f32 %v2067_v7, %v2732_v49  ;;  %v1288_v9 = vpack.c.bf16 %v1267_v37, %v1266_v2  ;;  %v1174_v13 = vmax.f32 %v1120_v3, 0.0  ;;  %v1272_v28 = vmul.f32 %v1876_v18, %v1176_v17 }
 0x224   : > { %v1122_v4 = vpop.f32.mrf.mxu1 }
 0x225   : > { %v1177_v14 = vmax.f32 %v1131_v8, 0.0  ;;  %v1123_v15 = vadd.f32 %v2732_v49, %v1122_v4  ;;  %2108 = vmatprep.mubr.bf16.mxu0 %v1288_v9  ;;  %v1270_v24 = vmul.f32 %v1872_v10, %v1174_v13 }
 0x226   : > { %v2070_v19 = vpop.f32.mrf.mxu1  ;;  %2109 = vmatmul.mubr.bf16.gmra.mxu0 %v1289_v11 }
 0x227   : > { %v1175_v20 = vmax.f32 %v1123_v15, 0.0  ;;  %v1273_v21 = vmul.f32 %v1877_v56, %v1177_v14  ;;  %v1144_v29 = vadd.f32 %v2070_v19, %v2732_v49 }
 0x228   : > { %v1135_v22 = vpop.f32.mrf.mxu1 }
 0x229   : > { %v1271_v25 = vmul.f32 %v1873_v16, %v1175_v20  ;;  %v1136_v26 = vadd.f32 %v2732_v49, %v1135_v22  ;;  %v1291_v39 = vpack.c.bf16 %v1273_v21, %v1272_v28  ;;  %v1180_v12 = vmax.f32 %v1144_v29, 0.0 }
 0x22a   : > { %v2071_v30 = vpop.f32.mrf.mxu1 }
 0x22b   : > { %v1147_v23 = vadd.f32 %v2071_v30, %v2732_v49  ;;  %v1290_v58 = vpack.c.bf16 %v1271_v25, %v1270_v24  ;;  %v1178_v40 = vmax.f32 %v1136_v26, 0.0  ;;  %v1276_v47 = vmul.f32 %v1884_v45, %v1180_v12 }
 0x22c   : > { %v1138_v38 = vpop.f32.mrf.mxu1 }
 0x22d   : > { %v1181_v60 = vmax.f32 %v1147_v23, 0.0  ;;  %v1139_v43 = vadd.f32 %v2732_v49, %v1138_v38  ;;  %2112 = vmatprep.mubr.bf16.mxu0 %v1290_v58  ;;  %v1274_v35 = vmul.f32 %v1880_v33, %v1178_v40 }
 0x22e   : > { %2113 = vmatmul.mubr.bf16.gmra.mxu0 %v1291_v39 }
 0x22f   : > { %v1179_v46 = vmax.f32 %v1139_v43, 0.0  ;;  %v1277_v32 = vmul.f32 %v1885_v36, %v1181_v60 }
 0x231   : > { %v1275_v34 = vmul.f32 %v1881_v44, %v1179_v46  ;;  %v1293_v42 = vpack.c.bf16 %v1277_v32, %v1276_v47 }
 0x233   : > { %v1292_v50 = vpack.c.bf16 %v1275_v34, %v1274_v35 }
 0x235   : > { %2116 = vmatprep.mubr.bf16.mxu0 %v1292_v50 }
 0x236   : > { %2117 = vmatmul.mubr.bf16.gmra.mxu0 %v1293_v42 }
 0x2be   : > { %v2090_v49 = vpop.f32.mrf.mxu0 }
 0x2bf   : > { %v1408_v52 = vadd.f32 %v2090_v49, %v2786_v51 }
 0x2c0   : > { %v1399_v53 = vpop.f32.mrf.mxu0 }
 0x2c1   : > { %1528 = vst [vmem:[%s2789_s26 + $0x10] sm:$0xff] %v1408_v52  ;;  %v1400_v54 = vadd.f32 %v2786_v51, %v1399_v53 }
 0x2c2   : > { %v2091_v55 = vpop.f32.mrf.mxu0 }
 0x2c3   : > { %1526 = vst [vmem:[%s2789_s26] sm:$0xff] %v1400_v54  ;;  %v1411_v57 = vadd.f32 %v2091_v55, %v2786_v51 }
 0x2c4   : > { %v1402_v59 = vpop.f32.mrf.mxu0 }
 0x2c5   : > { %1529 = vst [vmem:[%s2789_s26 + $0x18] sm:$0xff] %v1411_v57  ;;  %v1403_v61 = vadd.f32 %v2786_v51, %v1402_v59 }
 0x2c6   : > { %v2094_v62 = vpop.f32.mrf.mxu0 }
 0x2c7   : > { %1527 = vst [vmem:[%s2789_s26 + $0x8] sm:$0xff] %v1403_v61  ;;  %v1424_v63 = vadd.f32 %v2094_v62, %v2786_v51 }
 0x2c8   : > { %v1415_v0 = vpop.f32.mrf.mxu0 }
 0x2c9   : > { %1532 = vst [vmem:[%s2789_s26 + $0x30] sm:$0xff] %v1424_v63  ;;  %v1416_v1 = vadd.f32 %v2786_v51, %v1415_v0 }
 0x2ca   : > { %v2095_v2 = vpop.f32.mrf.mxu0 }
 0x2cb   : > { %1530 = vst [vmem:[%s2789_s26 + $0x20] sm:$0xff] %v1416_v1  ;;  %v1427_v37 = vadd.f32 %v2095_v2, %v2786_v51 }
 0x2cc   : > { %v1418_v3 = vpop.f32.mrf.mxu0 }
 0x2cd   : > { %1533 = vst [vmem:[%s2789_s26 + $0x38] sm:$0xff] %v1427_v37  ;;  %v1419_v41 = vadd.f32 %v2786_v51, %v1418_v3 }
 0x2ce   : > { %v2098_v5 = vpop.f32.mrf.mxu0 }
 0x2cf   : > { %1531 = vst [vmem:[%s2789_s26 + $0x28] sm:$0xff] %v1419_v41  ;;  %v1440_v6 = vadd.f32 %v2098_v5, %v2786_v51 }
 0x2d0   : > { %v1431_v7 = vpop.f32.mrf.mxu0 }
 0x2d1   : > { %1536 = vst [vmem:[%s2789_s26 + $0x50] sm:$0xff] %v1440_v6  ;;  %v1432_v48 = vadd.f32 %v2786_v51, %v1431_v7 }
 0x2d2   : > { %v2099_v8 = vpop.f32.mrf.mxu0 }
 0x2d3   : > { %1534 = vst [vmem:[%s2789_s26 + $0x40] sm:$0xff] %v1432_v48  ;;  %v1443_v9 = vadd.f32 %v2099_v8, %v2786_v51 }
 0x2d4   : > { %v1434_v10 = vpop.f32.mrf.mxu0 }
 0x2d5   : > { %1537 = vst [vmem:[%s2789_s26 + $0x58] sm:$0xff] %v1443_v9  ;;  %v1435_v56 = vadd.f32 %v2786_v51, %v1434_v10 }
 0x2d6   : > { %v2102_v4 = vpop.f32.mrf.mxu0 }
 0x2d7   : > { %1535 = vst [vmem:[%s2789_s26 + $0x48] sm:$0xff] %v1435_v56  ;;  %v1456_v11 = vadd.f32 %v2102_v4, %v2786_v51 }
 0x2d8   : > { %v1447_v13 = vpop.f32.mrf.mxu0 }
 0x2d9   : > { %1540 = vst [vmem:[%s2789_s26 + $0x70] sm:$0xff] %v1456_v11  ;;  %v1448_v14 = vadd.f32 %v2786_v51, %v1447_v13 }
 0x2da   : > { %v2103_v15 = vpop.f32.mrf.mxu0 }
 0x2db   : > { %1538 = vst [vmem:[%s2789_s26 + $0x60] sm:$0xff] %v1448_v14  ;;  %v1459_v16 = vadd.f32 %v2103_v15, %v2786_v51 }
 0x2dc   : > { %v1450_v17 = vpop.f32.mrf.mxu0 }
 0x2dd   : > { %1541 = vst [vmem:[%s2789_s26 + $0x78] sm:$0xff] %v1459_v16  ;;  %v1451_v18 = vadd.f32 %v2786_v51, %v1450_v17 }
 0x2de   : > { %v2106_v19 = vpop.f32.mrf.mxu0 }
 0x2df   : > { %1539 = vst [vmem:[%s2789_s26 + $0x68] sm:$0xff] %v1451_v18  ;;  %v1472_v20 = vadd.f32 %v2106_v19, %v2786_v51 }
 0x2e0   : > { %v1463_v21 = vpop.f32.mrf.mxu0 }
 0x2e1   : > { %1544 = vst [vmem:[%s2789_s26 + $0x90] sm:$0xff] %v1472_v20  ;;  %v1464_v22 = vadd.f32 %v2786_v51, %v1463_v21 }
 0x2e2   : > { %v2107_v24 = vpop.f32.mrf.mxu0 }
 0x2e3   : > { %1542 = vst [vmem:[%s2789_s26 + $0x80] sm:$0xff] %v1464_v22  ;;  %v1475_v25 = vadd.f32 %v2107_v24, %v2786_v51 }
 0x2e4   : > { %v1466_v26 = vpop.f32.mrf.mxu0 }
 0x2e5   : > { %1545 = vst [vmem:[%s2789_s26 + $0x98] sm:$0xff] %v1475_v25  ;;  %v1467_v27 = vadd.f32 %v2786_v51, %v1466_v26 }
 0x2e6   : > { %v2110_v28 = vpop.f32.mrf.mxu0 }
 0x2e7   : > { %1543 = vst [vmem:[%s2789_s26 + $0x88] sm:$0xff] %v1467_v27  ;;  %v1488_v29 = vadd.f32 %v2110_v28, %v2786_v51 }
 0x2e8   : > { %v1479_v30 = vpop.f32.mrf.mxu0 }
 0x2e9   : > { %1548 = vst [vmem:[%s2789_s26 + $0xb0] sm:$0xff] %v1488_v29  ;;  %v1480_v31 = vadd.f32 %v2786_v51, %v1479_v30 }
 0x2ea   : > { %v2111_v23 = vpop.f32.mrf.mxu0 }
 0x2eb   : > { %1546 = vst [vmem:[%s2789_s26 + $0xa0] sm:$0xff] %v1480_v31  ;;  %v1491_v58 = vadd.f32 %v2111_v23, %v2786_v51 }
 0x2ec   : > { %v1482_v33 = vpop.f32.mrf.mxu0 }
 0x2ed   : > { %1549 = vst [vmem:[%s2789_s26 + $0xb8] sm:$0xff] %v1491_v58  ;;  %v1483_v36 = vadd.f32 %v2786_v51, %v1482_v33 }
 0x2ee   : > { %v2114_v38 = vpop.f32.mrf.mxu0 }
 0x2ef   : > { %1547 = vst [vmem:[%s2789_s26 + $0xa8] sm:$0xff] %v1483_v36  ;;  %v1504_v39 = vadd.f32 %v2114_v38, %v2786_v51 }
 0x2f0   : > { %v1495_v40 = vpop.f32.mrf.mxu0 }
 0x2f1   : > { %1552 = vst [vmem:[%s2789_s26 + $0xd0] sm:$0xff] %v1504_v39  ;;  %v1496_v60 = vadd.f32 %v2786_v51, %v1495_v40 }
 0x2f2   : > { %v2115_v43 = vpop.f32.mrf.mxu0 }
 0x2f3   : > { %1550 = vst [vmem:[%s2789_s26 + $0xc0] sm:$0xff] %v1496_v60  ;;  %v1507_v44 = vadd.f32 %v2115_v43, %v2786_v51 }
 0x2f4   : > { %v1498_v12 = vpop.f32.mrf.mxu0 }
 0x2f5   : > { %1553 = vst [vmem:[%s2789_s26 + $0xd8] sm:$0xff] %v1507_v44  ;;  %v1499_v45 = vadd.f32 %v2786_v51, %v1498_v12 }
 0x2f6   : > { %v2118_v46 = vpop.f32.mrf.mxu0 }
 0x2f7   : > { %1551 = vst [vmem:[%s2789_s26 + $0xc8] sm:$0xff] %v1499_v45  ;;  %v1520_v32 = vadd.f32 %v2118_v46, %v2786_v51 }
 0x2f8   : > { %v1511_v35 = vpop.f32.mrf.mxu0 }
 0x2f9   : > { %1556 = vst [vmem:[%s2789_s26 + $0xf0] sm:$0xff] %v1520_v32  ;;  %v1512_v34 = vadd.f32 %v2786_v51, %v1511_v35 }
 0x2fa   : > { %v2119_v47 = vpop.f32.mrf.mxu0 }
 0x2fb   : > { %1554 = vst [vmem:[%s2789_s26 + $0xe0] sm:$0xff] %v1512_v34  ;;  %v1523_v50 = vadd.f32 %v2119_v47, %v2786_v51 }
 0x2fc   : > { %v1514_v42 = vpop.f32.mrf.mxu0 }
 0x2fd   : > { %1557 = vst [vmem:[%s2789_s26 + $0xf8] sm:$0xff] %v1523_v50  ;;  %v1515_v49 = vadd.f32 %v2786_v51, %v1514_v42 }
 0x2ff   : > { %1555 = vst [vmem:[%s2789_s26 + $0xe8] sm:$0xff] %v1515_v49 }
 0x300   : > { %2292 = shalt.err (!%p2289_p5)
}
 0x301   : > { %s2293_s25 = scalar_lea.hbm %s2856_s28, 4096  ;;  %s2297_s24 = scalar_lea.hbm %s2913_s9, 8192 }
 0x302   : > { %p2294_p2 = scmp.ne.s32.totalorder %s2856_s28, %s2293_s25  ;;  %p2298_p7 = scmp.lt.s32.totalorder %s2856_s28, %s2913_s9 }
 0x303   : > { %p2299_p4 = scmp.lt.s32.totalorder %s2297_s24, %s2293_s25 }
 0x304   : > { %p2295_p1 = pnand %p2294_p2, %p2940_p11 }
 0x305   : > { %p2300_p8 = por %p2299_p4, %p2298_p7 }
 0x306   : > { %p2296_p6 = pneg %p2295_p1 }
 0x308   : > { %p2301_p3 = pnand %p2300_p8, %p2296_p6 }
 0x30a   : > { %2304 = shalt.err (!%p2301_p3)
}
 0x30b   : > { %s2354_s17 = smov 128   ;;  %s2355_s27 = smov 8  }
 0x30c   : > { %2134 = dma.vmem_to_hbm [thread:$0]  (%p2940_p11), %s2858_s22, 4096, %s2856_s28, %s1559_s13, %s2354_s17, %s2354_s17, %s2355_s27  }
 0x30d PF: > { %s2941_s15 = sld [smem:[#allocation11_spill]]  ;;  %s1587_s19 = sand.u32 1, %s2335_s30  }
 0x30e   : > { %p2943_p10 = scmp.ge.s32.totalorder %s2347_s12, 2  ;;  %s1588_s18 = scalar_lea.sflag [#allocation4], %s1587_s19 }
 0x313   : > { %p2942_p9 = scmp.ne.s32.totalorder %s2941_s15, 0 }
 0x315   : > { %p2145_p12 = pnand %p2943_p10, %p2942_p9 }
 0x317   : > { %p2146_p13 = pneg %p2145_p12 }
 0x319   : > { %2330 = dma.done.wait (%p2146_p13), %s1588_s18, 4096  }
 0x31a   : > { %2332 = vsyncadd (%p2146_p13), %s1588_s18, 4294963200  ;;  %s2944_s12 = sld [smem:[#allocation12_spill]]  ;;  %s2945_s30 = smov %s2339_s10 }
 0x31b   : > { %s2946_s10 = smov %s2343_s11  ;;  %s2947_s11 = smov %s2480_s29 }
 0x320   : > { %p23_p0 = scmp.ge.s32.totalorder %s2944_s12, 4  }
 0x322   :  { %25 = sbr.rel (!%p23_p0) target bundleno = 8 (0x8), region = 112 }
 0x327   :  { %1593 = vsyncpa [#allocation3], 1 }
 0x328   :  { %1595 = vsyncpa [#allocation3 + $0x1], 1 }
 0x329   :  { %1596 = vsyncpa [#allocation6], 1 }
 0x32a   :  { %1598 = vsyncpa [#allocation6 + $0x1], 1 }
 0x32b   :  { %1599 = vsyncpa [#allocation4], 1 }
 0x32c   :  { %1601 = vsyncpa [#allocation4 + $0x1], 1 }

</bundles_post_ra>
